<compile_context>
chip_gen: v5e
topology: v5e:2x2
jax: 0.10.0
libtpu: 0.0.40
codegen_flags: <defaults>
</compile_context>

<pallas_src>
import functools

import jax
import jax.numpy as jnp
from jax import lax
from jax.experimental import pallas as pl
from jax.experimental.pallas import tpu as pltpu


# ---------------------------------------------------------------------------
# Kernels
# ---------------------------------------------------------------------------

def _fused_bn_kernel(x_ref, g_ref, b_ref, o_ref, *, n, c, eps, inv_count):
    """Single-pass BN for a (tb, N*C, HW) block: stats + normalize fused.

    Sublane dim is N*C (rows n*C + c), lane dim is HW.  All cross-N work
    happens on tiny (tb, *, 1) arrays after the lane reduction.
    """
    xf = x_ref[...].astype(jnp.float32)                      # (tb, N*C, HW)
    s1 = jnp.sum(xf, axis=2, keepdims=True)                  # (tb, N*C, 1)
    s2 = jnp.sum(xf * xf, axis=2, keepdims=True)             # (tb, N*C, 1)

    # Cross-N reduction on the tiny per-row sums: contiguous sublane slices.
    tot1 = s1[:, 0:c, :]
    tot2 = s2[:, 0:c, :]
    for i in range(1, n):
        tot1 = tot1 + s1[:, i * c:(i + 1) * c, :]
        tot2 = tot2 + s2[:, i * c:(i + 1) * c, :]

    mean = tot1 * inv_count                                   # (tb, C, 1)
    var = jnp.maximum(tot2 * inv_count - mean * mean, 0.0)    # clamp cancellation
    inv_std = lax.rsqrt(var + eps)                            # EUP rsqrt

    g = g_ref[...].astype(jnp.float32)                        # (tb|1, C, 1)
    b = b_ref[...].astype(jnp.float32)
    scale = inv_std * g                                       # (tb, C, 1)
    shift = b - mean * scale                                  # (tb, C, 1)

    # Replicate per-channel scale/shift across the N groups of the sublane dim.
    if n > 1:
        scale_nc = jnp.concatenate([scale] * n, axis=1)       # (tb, N*C, 1)
        shift_nc = jnp.concatenate([shift] * n, axis=1)
    else:
        scale_nc, shift_nc = scale, shift

    # Re-read / re-cast x so the f32 stats copy above need not stay live.
    y = x_ref[...].astype(jnp.float32) * scale_nc + shift_nc
    o_ref[...] = y.astype(o_ref.dtype)


def _stats_kernel(x_ref, s1_ref, s2_ref):
    """Accumulate per-(t, c) sum / sum-of-squares across N-chunks."""
    @pl.when(pl.program_id(1) == 0)
    def _():
        s1_ref[...] = jnp.zeros_like(s1_ref)
        s2_ref[...] = jnp.zeros_like(s2_ref)

    x = x_ref[...].astype(jnp.float32)                        # (1, nb, C, HW)
    p1 = jnp.sum(jnp.sum(x, axis=3), axis=1, keepdims=True)   # (1, 1, C)
    p2 = jnp.sum(jnp.sum(x * x, axis=3), axis=1, keepdims=True)
    s1_ref[...] += p1
    s2_ref[...] += p2


def _norm_kernel(x_ref, s1_ref, s2_ref, g_ref, b_ref, o_ref, *, eps, inv_count):
    """Normalize one (1, nb, C, HW) chunk using precomputed per-(t, c) stats."""
    x = x_ref[...].astype(jnp.float32)                        # (1, nb, C, HW)
    mean = s1_ref[...] * inv_count                            # (1, 1, C)
    var = jnp.maximum(s2_ref[...] * inv_count - mean * mean, 0.0)
    inv_std = lax.rsqrt(var + eps)
    g = g_ref[...].astype(jnp.float32)
    b = b_ref[...].astype(jnp.float32)
    scale = (inv_std * g)[:, :, :, None]                      # (1, 1, C, 1)
    shift = (b - mean * inv_std * g)[:, :, :, None]
    o_ref[...] = (x * scale + shift).astype(o_ref.dtype)


# ---------------------------------------------------------------------------
# Generation-aware sizing helpers
# ---------------------------------------------------------------------------

def _tpu_budgets():
    """(block_budget_bytes, vmem_limit_cap_bytes, min_grid_steps) per generation."""
    kind = ""
    try:
        kind = jax.devices()[0].device_kind.lower()
    except Exception:
        pass
    if "v7" in kind:
        # 64 MiB physical VMEM / core, 2 TensorCores -> smaller blocks,
        # keep >= 2 grid steps per core so DMA/VPU still overlap.
        return 6 << 20, 52 << 20, 4
    if ("v6" in kind or "trillium" in kind
            or "v5e" in kind or "v5 lite" in kind or "v5litepod" in kind):
        # 128 MiB physical VMEM, single TensorCore -> big blocks, high cap.
        return 12 << 20, 96 << 20, 2
    # Unknown / v4 / v5p: dual-core, be conservative on the cap.
    return 6 << 20, 48 << 20, 4


def _pick_tb(T, per_step_bytes, budget, min_grid):
    """Time steps folded per block: fit the budget, keep >= min_grid grid steps."""
    by_budget = max(1, budget // max(per_step_bytes, 1))
    by_grid = max(1, -(-T // max(min_grid, 1)))   # ceil(T / min_grid)
    return max(1, min(T, by_budget, by_grid))


def _vmem_limit(block_bytes, cap):
    """Scoped-VMEM limit: double-buffered in/out + f32 temporaries + headroom."""
    need = 8 * block_bytes + (2 << 20)
    return int(min(max(need, 32 << 20), cap))


# ---------------------------------------------------------------------------
# Wrapper
# ---------------------------------------------------------------------------

def temporal_bn(x, gamma, beta, *, step_wise=False, eps=1e-5,
                block_budget_bytes=None, max_fused_bytes=None):
    """x: (T, N, C, H, W). gamma/beta: (C,) if not step_wise else (T, C)."""
    T, N, C, H, W = x.shape
    HW = H * W
    inv_count = 1.0 / float(N * HW)
    itemsize = jnp.dtype(x.dtype).itemsize
    elems = T * N * C * HW

    budget, vmem_cap, min_grid = _tpu_budgets()
    if block_budget_bytes is not None:
        budget = int(block_budget_bytes)
    path_a_max = budget if max_fused_bytes is None else int(max_fused_bytes)

    per_step_bytes = N * C * HW * itemsize
    # Two-pass N-chunked fallback only when a single step exceeds the fused
    # budget and there is an N axis to split (always legal, no lane alignment).
    use_chunked = per_step_bytes > path_a_max and N >= 2

    if not use_chunked:
        # ------------------------- Path A: single fused pass ----------------
        xr = x.reshape(T, N * C, HW)               # pure reshape, no HBM copy
        tb = _pick_tb(T, per_step_bytes, budget, min_grid)
        grid = (pl.cdiv(T, tb),)

        x_spec = pl.BlockSpec((tb, N * C, HW), lambda i: (i, 0, 0))
        if step_wise:
            g3 = gamma.reshape(T, C, 1)
            b3 = beta.reshape(T, C, 1)
            p_spec = pl.BlockSpec((tb, C, 1), lambda i: (i, 0, 0))
        else:
            g3 = gamma.reshape(1, C, 1)
            b3 = beta.reshape(1, C, 1)
            p_spec = pl.BlockSpec((1, C, 1), lambda i: (0, 0, 0))

        out = pl.pallas_call(
            functools.partial(_fused_bn_kernel, n=N, c=C,
                              eps=eps, inv_count=inv_count),
            out_shape=jax.ShapeDtypeStruct((T, N * C, HW), x.dtype),
            grid_spec=pltpu.PrefetchScalarGridSpec(
                num_scalar_prefetch=0,
                grid=grid,
                in_specs=[x_spec, p_spec, p_spec],
                out_specs=x_spec,
            ),
            compiler_params=pltpu.CompilerParams(
                dimension_semantics=("parallel",),
                vmem_limit_bytes=_vmem_limit(tb * per_step_bytes, vmem_cap),
            ),
            cost_estimate=pl.CostEstimate(
                flops=7 * elems,
                transcendentals=T * C,
                bytes_accessed=2 * elems * itemsize),
        )(xr, g3, b3)
        return out.reshape(T, N, C, H, W)

    # --------------------- Path B: N-chunked two-pass ------------------------
    xr4 = x.reshape(T, N, C, HW)                   # pure reshape
    slab = C * HW * itemsize                       # bytes per (n, t) slab
    nb = 1
    for d in range(1, N + 1):                      # largest divisor of N in budget
        if N % d == 0 and d * slab <= budget:
            nb = d
    n_chunks = N // nb
    vmem = _vmem_limit(nb * slab, vmem_cap)

    x_spec = pl.BlockSpec((1, nb, C, HW), lambda t, j: (t, j, 0, 0))
    stat_spec = pl.BlockSpec((1, 1, C), lambda t, j: (t, 0, 0))
    if step_wise:
        pg = gamma.reshape(T, 1, C)
        pb = beta.reshape(T, 1, C)
        p_spec = pl.BlockSpec((1, 1, C), lambda t, j: (t, 0, 0))
    else:
        pg = gamma.reshape(1, 1, C)
        pb = beta.reshape(1, 1, C)
        p_spec = pl.BlockSpec((1, 1, C), lambda t, j: (0, 0, 0))

    s1, s2 = pl.pallas_call(
        _stats_kernel,
        out_shape=(jax.ShapeDtypeStruct((T, 1, C), jnp.float32),
                   jax.ShapeDtypeStruct((T, 1, C), jnp.float32)),
        grid_spec=pltpu.PrefetchScalarGridSpec(
            num_scalar_prefetch=0,
            grid=(T, n_chunks),
            in_specs=[x_spec],
            out_specs=[stat_spec, stat_spec],
        ),
        compiler_params=pltpu.CompilerParams(
            dimension_semantics=("parallel", "arbitrary"),
            vmem_limit_bytes=vmem,
        ),
        cost_estimate=pl.CostEstimate(
            flops=3 * elems, transcendentals=0,
            bytes_accessed=elems * itemsize + 8 * T * C),
    )(xr4)

    out = pl.pallas_call(
        functools.partial(_norm_kernel, eps=eps, inv_count=inv_count),
        out_shape=jax.ShapeDtypeStruct((T, N, C, HW), x.dtype),
        grid_spec=pltpu.PrefetchScalarGridSpec(
            num_scalar_prefetch=0,
            grid=(T, n_chunks),
            in_specs=[x_spec, stat_spec, stat_spec, p_spec, p_spec],
            out_specs=x_spec,
        ),
        compiler_params=pltpu.CompilerParams(
            dimension_semantics=("parallel", "parallel"),
            vmem_limit_bytes=vmem,
        ),
        cost_estimate=pl.CostEstimate(
            flops=2 * elems, transcendentals=T * C,
            bytes_accessed=2 * elems * itemsize),
    )(xr4, s1, s2, pg, pb)
    return out.reshape(T, N, C, H, W)


# ---------------------------------------------------------------------------
# Pure-JAX reference (training-mode BN per step, as torch does)
# ---------------------------------------------------------------------------

def _reference_temporal_bn(x, gamma, beta, *, step_wise=False, eps=1e-5):
    T, N, C, H, W = x.shape
    outs = []
    for t in range(T):
        xt = x[t].astype(jnp.float32)                                  # (N, C, H, W)
        mean = jnp.mean(xt, axis=(0, 2, 3), keepdims=True)
        var = jnp.mean((xt - mean) ** 2, axis=(0, 2, 3), keepdims=True)
        g = (gamma[t] if step_wise else gamma).reshape(1, C, 1, 1)
        b = (beta[t] if step_wise else beta).reshape(1, C, 1, 1)
        outs.append(((xt - mean) * lax.rsqrt(var + eps) * g + b).astype(x.dtype))
    return jnp.stack(outs)


if __name__ == "__main__":
    # Small shapes consistent with the module: nb_steps=8, batch=2, channels=4, 16x16.
    T, N, C, H, W = 8, 2, 4, 16, 16
    key = jax.random.PRNGKey(0)
    kx, kg, kb, kgs, kbs = jax.random.split(key, 5)

    x = jax.random.normal(kx, (T, N, C, H, W), dtype=jnp.float32)

    # Shared-parameter variant (step_wise=False): BatchNorm2d affine params (C,).
    gamma = 1.0 + 0.1 * jax.random.normal(kg, (C,), dtype=jnp.float32)
    beta = 0.1 * jax.random.normal(kb, (C,), dtype=jnp.float32)

    y = temporal_bn(x, gamma, beta, step_wise=False)
    jax.block_until_ready(y)
    y_ref = _reference_temporal_bn(x, gamma, beta, step_wise=False)
    assert y.shape == (T, N, C, H, W)
    assert float(jnp.max(jnp.abs(y - y_ref))) < 2e-4

    # Per-step parameter variant (step_wise=True): distinct params per step.
    gamma_sw = 1.0 + 0.1 * jax.random.normal(kgs, (T, C), dtype=jnp.float32)
    beta_sw = 0.1 * jax.random.normal(kbs, (T, C), dtype=jnp.float32)
    y_sw = temporal_bn(x, gamma_sw, beta_sw, step_wise=True)
    jax.block_until_ready(y_sw)
    y_sw_ref = _reference_temporal_bn(x, gamma_sw, beta_sw, step_wise=True)
    assert float(jnp.max(jnp.abs(y_sw - y_sw_ref))) < 2e-4

    # Force the two-pass N-chunked fallback (Path B) on the same small shape so
    # that path also gets compiled and checked.
    y_b = temporal_bn(x, gamma, beta, step_wise=False,
                      max_fused_bytes=0, block_budget_bytes=4096)
    jax.block_until_ready(y_b)
    assert float(jnp.max(jnp.abs(y_b - y_ref))) < 2e-4

    print("KERNEL_OK")
</pallas_src>

<mosaic_0001>
module attributes {stable_mosaic.version = 11 : i64} {
  func.func @_fused_bn_kernel(%arg0: i32, %arg1: memref<2x8x256xf32, #tpu.memory_space<vmem>>, %arg2: memref<1x4x1xf32, #tpu.memory_space<vmem>>, %arg3: memref<1x4x1xf32, #tpu.memory_space<vmem>>, %arg4: memref<2x8x256xf32, #tpu.memory_space<vmem>>) attributes {dimension_semantics = [#tpu.dimension_semantics<parallel>], iteration_bounds = array<i64: 4>, scalar_prefetch = 0 : i64, scratch_operands = 0 : i64, tpu.core_type = #tpu.core_type<tc>, window_params = [{transform_indices = @transform_0, window_bounds = array<i64: 2, 8, 256>}, {pipeline_mode = #tpu.pipeline_mode<synchronous>, transform_indices = @transform_1, window_bounds = array<i64: 1, 4, 1>}, {pipeline_mode = #tpu.pipeline_mode<synchronous>, transform_indices = @transform_2, window_bounds = array<i64: 1, 4, 1>}, {transform_indices = @transform_3, window_bounds = array<i64: 2, 8, 256>}]} {
    %c0 = arith.constant 0 : index
    %c0_0 = arith.constant 0 : index
    %c0_1 = arith.constant 0 : index
    %0 = vector.load %arg1[%c0, %c0_0, %c0_1] : memref<2x8x256xf32, #tpu.memory_space<vmem>>, vector<2x8x256xf32>
    %cst = arith.constant dense<0.000000e+00> : vector<2x8xf32>
    %1 = vector.multi_reduction <add>, %0, %cst [2] : vector<2x8x256xf32> to vector<2x8xf32>
    %2 = vector.shape_cast %1 : vector<2x8xf32> to vector<2x8x1xf32>
    %3 = arith.mulf %0, %0 : vector<2x8x256xf32>
    %cst_2 = arith.constant dense<0.000000e+00> : vector<2x8xf32>
    %4 = vector.multi_reduction <add>, %3, %cst_2 [2] : vector<2x8x256xf32> to vector<2x8xf32>
    %5 = vector.shape_cast %4 : vector<2x8xf32> to vector<2x8x1xf32>
    %6 = vector.extract_strided_slice %2 {offsets = [0, 0, 0], sizes = [2, 4, 1], strides = [1, 1, 1]} : vector<2x8x1xf32> to vector<2x4x1xf32>
    %7 = vector.extract_strided_slice %5 {offsets = [0, 0, 0], sizes = [2, 4, 1], strides = [1, 1, 1]} : vector<2x8x1xf32> to vector<2x4x1xf32>
    %8 = vector.extract_strided_slice %2 {offsets = [0, 4, 0], sizes = [2, 4, 1], strides = [1, 1, 1]} : vector<2x8x1xf32> to vector<2x4x1xf32>
    %9 = arith.addf %6, %8 : vector<2x4x1xf32>
    %10 = vector.extract_strided_slice %5 {offsets = [0, 4, 0], sizes = [2, 4, 1], strides = [1, 1, 1]} : vector<2x8x1xf32> to vector<2x4x1xf32>
    %11 = arith.addf %7, %10 : vector<2x4x1xf32>
    %cst_3 = arith.constant 0.001953125 : f32
    %12 = vector.broadcast %cst_3 : f32 to vector<2x4x1xf32>
    %13 = arith.mulf %9, %12 : vector<2x4x1xf32>
    %cst_4 = arith.constant 0.001953125 : f32
    %14 = vector.broadcast %cst_4 : f32 to vector<2x4x1xf32>
    %15 = arith.mulf %11, %14 : vector<2x4x1xf32>
    %16 = arith.mulf %13, %13 : vector<2x4x1xf32>
    %17 = arith.subf %15, %16 : vector<2x4x1xf32>
    %cst_5 = arith.constant 0.000000e+00 : f32
    %18 = vector.broadcast %cst_5 : f32 to vector<2x4x1xf32>
    %19 = arith.maximumf %17, %18 : vector<2x4x1xf32>
    %cst_6 = arith.constant 9.99999974E-6 : f32
    %20 = vector.broadcast %cst_6 : f32 to vector<2x4x1xf32>
    %21 = arith.addf %19, %20 : vector<2x4x1xf32>
    %22 = math.rsqrt %21 : vector<2x4x1xf32>
    %c0_7 = arith.constant 0 : index
    %c0_8 = arith.constant 0 : index
    %c0_9 = arith.constant 0 : index
    %23 = vector.load %arg2[%c0_7, %c0_8, %c0_9] : memref<1x4x1xf32, #tpu.memory_space<vmem>>, vector<1x4x1xf32>
    %c0_10 = arith.constant 0 : index
    %c0_11 = arith.constant 0 : index
    %c0_12 = arith.constant 0 : index
    %24 = vector.load %arg3[%c0_10, %c0_11, %c0_12] : memref<1x4x1xf32, #tpu.memory_space<vmem>>, vector<1x4x1xf32>
    %25 = vector.broadcast %23 : vector<1x4x1xf32> to vector<2x4x1xf32>
    %26 = arith.mulf %22, %25 : vector<2x4x1xf32>
    %27 = arith.mulf %13, %26 : vector<2x4x1xf32>
    %28 = vector.broadcast %24 : vector<1x4x1xf32> to vector<2x4x1xf32>
    %29 = arith.subf %28, %27 : vector<2x4x1xf32>
    %30 = tpu.concatenate %26, %26 in 1 : vector<2x4x1xf32>, vector<2x4x1xf32> -> vector<2x8x1xf32>
    %31 = tpu.concatenate %29, %29 in 1 : vector<2x4x1xf32>, vector<2x4x1xf32> -> vector<2x8x1xf32>
    %c0_13 = arith.constant 0 : index
    %c0_14 = arith.constant 0 : index
    %c0_15 = arith.constant 0 : index
    %32 = vector.load %arg1[%c0_13, %c0_14, %c0_15] : memref<2x8x256xf32, #tpu.memory_space<vmem>>, vector<2x8x256xf32>
    %33 = vector.broadcast %30 : vector<2x8x1xf32> to vector<2x8x256xf32>
    %34 = arith.mulf %32, %33 : vector<2x8x256xf32>
    %35 = vector.broadcast %31 : vector<2x8x1xf32> to vector<2x8x256xf32>
    %36 = arith.addf %34, %35 : vector<2x8x256xf32>
    %c0_16 = arith.constant 0 : index
    %c0_17 = arith.constant 0 : index
    %c0_18 = arith.constant 0 : index
    %37 = vector.load %arg4[%c0_16, %c0_17, %c0_18] : memref<2x8x256xf32, #tpu.memory_space<vmem>>, vector<2x8x256xf32>
    tpu.vector_store %arg4[%c0_16, %c0_17, %c0_18], %36 {strides = array<i32>} : memref<2x8x256xf32, #tpu.memory_space<vmem>>, vector<2x8x256xf32>,
    return
  }
  func.func @transform_0(%arg0: i32) -> (i32, i32, i32) {
    %c0_i32 = arith.constant 0 : i32
    %c0_i32_0 = arith.constant 0 : i32
    %c0_i32_1 = arith.constant 0 : i32
    return %arg0, %c0_i32, %c0_i32_0 : i32, i32, i32
  }
  func.func @transform_1(%arg0: i32) -> (i32, i32, i32) {
    %c0_i32 = arith.constant 0 : i32
    %c0_i32_0 = arith.constant 0 : i32
    %c0_i32_1 = arith.constant 0 : i32
    %c0_i32_2 = arith.constant 0 : i32
    return %c0_i32, %c0_i32_0, %c0_i32_1 : i32, i32, i32
  }
  func.func @transform_2(%arg0: i32) -> (i32, i32, i32) {
    %c0_i32 = arith.constant 0 : i32
    %c0_i32_0 = arith.constant 0 : i32
    %c0_i32_1 = arith.constant 0 : i32
    %c0_i32_2 = arith.constant 0 : i32
    return %c0_i32, %c0_i32_0, %c0_i32_1 : i32, i32, i32
  }
  func.func @transform_3(%arg0: i32) -> (i32, i32, i32) {
    %c0_i32 = arith.constant 0 : i32
    %c0_i32_0 = arith.constant 0 : i32
    %c0_i32_1 = arith.constant 0 : i32
    return %arg0, %c0_i32, %c0_i32_0 : i32, i32, i32
  }
}

</mosaic_0001>

<bundles_post_ra>
// kernel: tpu_custom_call.1
= control target key start
LH: loop header
LB: loop body
LE: loop exit
PB: predicated region body
PF: predicated region fallthrough
CT: control target
= control target key end

     0   :  { %8 = vsyncpa [#allocation3], 0  ;;  %s773_s0 = inlined_call_operand.hbm [shape: f32[8,8,256], index: 0, kind: input, shape index: {}]   ;;  %s774_s1 = inlined_call_operand.vmem [shape: f32[1,4,1], index: 1, kind: input, shape index: {}]   ;;  %s775_s2 = inlined_call_operand.vmem [shape: f32[1,4,1], index: 2, kind: input, shape index: {}]   ;;  %s776_s3 = inlined_call_operand.hbm [shape: f32[8,8,256], index: 3, kind: output, shape index: {}]  }
   0x1   :  { %10 = vsyncpa [#allocation3 + $0x1], 0 }
   0x2   :  { %11 = vsyncpa [#allocation4], 0 }
   0x3   :  { %13 = vsyncpa [#allocation4 + $0x1], 0  ;;  %s610_s12 = smov 0   ;;  %s612_s13 = smov 0  }
   0x4   :  { %s614_s14 = smov 0   ;;  %s616_s15 = smov 0  }
   0x5 LB: > { %s631_s16 = sadd.s32 4294967295, %s583_s15   ;;  %s409_s17 = sadd.s32 4294967294, %s583_s15   ;;  %s583_s15 = sphi %s616_s15, %s785_s15   ;;  %s579_s14 = sphi %s614_s14, %s784_s14   ;;  %s575_s13 = sphi %s612_s13, %s783_s13   ;;  %s571_s12 = sphi %s610_s12, %s782_s12  }
   0x6   : > { %s635_s18 = sadd.s32 1, %s583_s15   ;;  %s26_s19 = sadd.s32 1, %s579_s14 }
   0x7   : > { %s23_s20 = ssub.s32 %s583_s15, %s635_s18  ;;  %p33_p0 = scmp.ne.s32.totalorder %s579_s14, %s575_s13 }
   0x8   : > { %p24_p1 = scmp.eq.s32.totalorder %s23_s20, 0  ;;  %p34_p2 = scmp.eq.s32.totalorder %s583_s15, 0 }
   0x9   : > { %p39_p3 = scmp.ne.s32.totalorder %s575_s13, %s571_s12  ;;  %p40_p4 = scmp.eq.s32.totalorder %s631_s16, 0 }
   0xa   : > { %s647_s21 = scalar_select %p24_p1, %s579_s14, %s26_s19  }
   0xb   : > { %p649_p5 = por %p34_p2, %p33_p0  ;;  %p653_p6 = por %p40_p4, %p39_p3 }
   0xc   : > { %p105_p7 = scmp.eq.s32.totalorder %s631_s16, 3  ;;  %p111_p8 = scmp.eq.s32.totalorder %s409_s17, 3 }
   0xd   : > { %p441_p9 = scmp.lt.s32.totalorder %s583_s15, 4  ;;  %s137_s26 = sand.u32 1, %s579_s14  }
   0xe   : > { %p659_p10 = por %p105_p7, %p33_p0  ;;  %p663_p11 = por %p111_p8, %p39_p3 }
   0xf   : > { %s426_s27 = sshll.u32 %s583_s15, 5  ;;  %s412_s28 = sshll.u32 %s137_s26, 5 }
  0x10   : > { %s147_s4 = scalar_lea.hbm %s773_s0, %s426_s27  ;;  %s141_s6 = scalar_lea.vmem [#allocation2], %s412_s28 }
  0x11   : > { %s148_s5 = sshll.u32 %s147_s4, 4  ;;  %s150_s7 = sshll.u32 %s141_s6, 4  ;;  %s149_s5 = int_to_ptr.hbm [resolvable:$true] %s148_s5  ;;  %s151_s7 = int_to_ptr.vmem [resolvable:$true] %s150_s7 }
  0x12   : > { %p674_p12 = pnand %p441_p9, %p649_p5  ;;  %p416_p13 = scmp.ge.s32.totalorder %s583_s15, 1 }
  0x13   : > { %p158_p0 = scmp.lt.s32.totalorder %s583_s15, 5  ;;  %s138_s9 = scalar_lea.sflag [#allocation3], %s137_s26 }
  0x14   : > { %s487_s10 = sshra.s32 %s149_s5, 4  ;;  %p491_p2 = pneg %p674_p12  ;;  %s488_s10 = int_to_ptr.hbm [resolvable:$true] %s487_s10 }
  0x15   : > { %s489_s11 = scalar_lea.hbm %s488_s10, 32  ;;  %s494_s20 = scalar_lea.hbm %s773_s0, 128 }
  0x16   : > { %p490_p1 = scmp.ne.s32.totalorder %s488_s10, %s489_s11  ;;  %p495_p5 = scmp.lt.s32.totalorder %s488_s10, %s773_s0 }
  0x17   : > { %p496_p7 = scmp.lt.s32.totalorder %s494_s20, %s489_s11 }
  0x18   : > { %p492_p3 = pnand %p491_p2, %p490_p1 }
  0x19   : > { %p497_p8 = por %p496_p7, %p495_p5 }
  0x1a   : > { %p493_p4 = pneg %p492_p3 }
  0x1c   : > { %p498_p9 = pnand %p497_p8, %p493_p4 }
  0x1e   : > { %501 = shalt.err (!%p498_p9)
}
  0x1f   : > { %s585_s26 = smov 256   ;;  %s586_s28 = smov 16  }
  0x20   : > { %436 = dma.hbm_to_vmem [thread:$0]  (!%p674_p12), %s149_s5, 512, %s151_s7, %s138_s9, %s585_s26, %s585_s26, %s586_s28  }
  0x21   : > { %p159_p1 = pnand %p416_p13, %p158_p0 }
  0x22   : > { %s695_s29 = sand.u32 (!%p159_p1), 1, %s575_s13  }
  0x23   : > { %162 = sbr.rel (%p159_p1) target bundleno = 331 (0x14b), region = 32  ;;  %s417_s30 = sshll.u32 (!%p159_p1), %s695_s29, 5 }
  0x24   : > { %s165_s4 = scalar_lea.sflag (!%p159_p1), [#allocation3], %s695_s29  ;;  %s168_s6 = scalar_lea.vmem (!%p159_p1), [#allocation2], %s417_s30 }
  0x28   : > { %562 = dma.done.wait (%p653_p6), %s165_s4, 512  }
  0x29   : > { %564 = vsyncadd (%p653_p6), %s165_s4, 4294966784  ;;  %v705_v0 = vld [vmem:[%s168_s6] sm:$0xff]  ;;  %v707_v1 = vld [vmem:[%s168_s6 + $0x8] sm:$0xff]  ;;  %v587_v19 = vmov 0   ;;  %vm276_vm3 = vcmask 1043456   ;;  %s428_s9 = sshll.u32 %s631_s16, 5 }
  0x2a   : > { %v198_v2 = vadd.f32 %v707_v1, %v705_v0  ;;  %v204_v3 = vmul.f32 %v705_v0, %v705_v0  ;;  %v205_v4 = vmul.f32 %v707_v1, %v707_v1  ;;  %v715_v5 = vld [vmem:[%s168_s6 + $0x10] sm:$0xff]  ;;  %v717_v6 = vld [vmem:[%s168_s6 + $0x18] sm:$0xff]  ;;  %480 = vset.pattern.permute.xlu2 %v587_v19  ;;  %481 = vset.pattern.permute.xlu0 %v587_v19  ;;  %v262_v45 = vld [vmem:[%s774_s1] sm:$0xf]  ;;  %s191_s10 = scalar_lea.vmem [#allocation5], %s417_s30  ;;  %s332_s19 = scalar_lea.hbm %s776_s3, %s428_s9 }
  0x2b   : > { %v206_v8 = vmul.f32 %v715_v5, %v715_v5  ;;  %v207_v9 = vmul.f32 %v717_v6, %v717_v6  ;;  %v201_v10 = vadd.f32 %v717_v6, %v715_v5  ;;  %482 = vset.pattern.permute.xlu1 %v587_v19  ;;  %v263_v50 = vld [vmem:[%s775_s2] sm:$0xf]  ;;  %s333_s20 = sshll.u32 %s191_s10, 4  ;;  %s335_s22 = sshll.u32 %s332_s19, 4  ;;  %s334_s20 = int_to_ptr.vmem [resolvable:$true] %s333_s20  ;;  %s336_s22 = int_to_ptr.hbm [resolvable:$true] %s335_s22 }
  0x2c   : > { %199 = vadd.xlane.f32.xlu0 %v198_v2  ;;  %v208_v7 = vadd.f32 %v205_v4, %v204_v3  ;;  %s320_s16 = scalar_lea.sflag [#allocation4], %s695_s29  ;;  %s531_s27 = sshra.s32 %s336_s22, 4  ;;  %s532_s27 = int_to_ptr.hbm [resolvable:$true] %s531_s27 }
  0x2d   : > { %v211_v11 = vadd.f32 %v207_v9, %v206_v8  ;;  %s533_s26 = scalar_lea.hbm %s532_s27, 32  ;;  %s537_s4 = scalar_lea.hbm %s776_s3, 128 }
  0x2e   : > { %209 = vadd.xlane.f32.xlu1 %v208_v7  ;;  %p534_p6 = scmp.ne.s32.totalorder %s532_s27, %s533_s26  ;;  %p538_p0 = scmp.lt.s32.totalorder %s532_s27, %s776_s3 }
  0x2f   : > { %p539_p2 = scmp.lt.s32.totalorder %s537_s4, %s533_s26 }
  0x30   : > { %p535_p12 = pnand %p534_p6, %p659_p10 }
  0x31   : > { %p540_p3 = por %p539_p2, %p538_p0 }
  0x32   : > { %p536_p13 = pneg %p535_p12 }
  0x34   : > { %202 = vadd.xlane.f32.xlu0 %v201_v10  ;;  %p541_p4 = pnand %p540_p3, %p536_p13 }
  0x36   : > { %212 = vadd.xlane.f32.xlu1 %v211_v11 }
  0x9f   : > { %v200_v12 = vpop.xlane.xlu0 %199 }
  0xa0   : > { %v216_v13 = vrot.slane %v200_v12, 4 }
  0xa1   : > { %v210_v14 = vpop.xlane.xlu1 %209 }
  0xa2   : > { %v220_v15 = vadd.f32 %v216_v13, %v200_v12  ;;  %v224_v16 = vrot.slane %v210_v14, 4 }
  0xa4   : > { %v230_v17 = vmul.f32 0.001953125, %v220_v15  ;;  %v228_v18 = vadd.f32 %v224_v16, %v210_v14 }
  0xa6   : > { %v234_v20 = vmul.f32 %v230_v17, %v230_v17  ;;  %v232_v21 = vmul.f32 0.001953125, %v228_v18 }
  0xa7   : > { %v203_v22 = vpop.xlane.xlu0 %202 }
  0xa8   : > { %v236_v23 = vsub.f32 %v232_v21, %v234_v20  ;;  %v217_v24 = vrot.slane %v203_v22, 4 }
  0xa9   : > { %v213_v25 = vpop.xlane.xlu1 %212 }
  0xaa   : > { %v238_v26 = vmax.f32 %v236_v23, 0.0  ;;  %v221_v27 = vadd.f32 %v217_v24, %v203_v22  ;;  %v225_v28 = vrot.slane %v213_v25, 4 }
  0xac   : > { %v240_v29 = vadd.f32 1e-05, %v238_v26  ;;  %v231_v30 = vmul.f32 0.001953125, %v221_v27  ;;  %v229_v31 = vadd.f32 %v225_v28, %v213_v25 }
  0xae   : > { %483 = vrsqrt.f32 %v240_v29  ;;  %v235_v32 = vmul.f32 %v231_v30, %v231_v30  ;;  %v233_v33 = vmul.f32 0.001953125, %v229_v31  ;;  %vm248_vm1 = vweird.f32 %v240_v29 }
  0xb0   : > { %v237_v34 = vsub.f32 %v233_v33, %v235_v32 }
  0xb2   : > { %v239_v35 = vmax.f32 %v237_v34, 0.0 }
  0xb4   : > { %v484_v36 = vpop.eup %483  ;;  %v241_v37 = vadd.f32 1e-05, %v239_v35 }
  0xb5   : > { %v243_v38 = vmul.f32 %v484_v36, %v240_v29  ;;  %vm249_vm0 = vweird.f32 %v484_v36 }
  0xb6   : > { %485 = vrsqrt.f32 %v241_v37  ;;  %vm250_vm2 = vmor %vm248_vm1, %vm249_vm0  ;;  %vm258_vm5 = vweird.f32 %v241_v37 }
  0xb7   : > { %v244_v39 = vmul.f32 %v484_v36, %v243_v38 }
  0xb9   : > { %v245_v40 = vmul.f32 0.5, %v244_v39 }
  0xbb   : > { %v246_v41 = vsub.f32 1.5, %v245_v40 }
  0xbc   : > { %v486_v42 = vpop.eup %485 }
  0xbd   : > { %v253_v43 = vmul.f32 %v486_v42, %v241_v37  ;;  %v247_v44 = vmul.f32 %v484_v36, %v246_v41  ;;  %vm259_vm4 = vweird.f32 %v486_v42 }
  0xbe   : > { %vm260_vm6 = vmor %vm258_vm5, %vm259_vm4 }
  0xbf   : > { %v254_v46 = vmul.f32 %v486_v42, %v253_v43  ;;  %v251_v47 = vsel %vm250_vm2, %v484_v36, %v247_v44 }
  0xc0   : > { %v264_v48 = vmul.f32 %v262_v45, %v251_v47 }
  0xc1   : > { %v255_v49 = vmul.f32 0.5, %v254_v46 }
  0xc2   : > { %v272_v51 = vrot.slane %v264_v48, 4  ;;  %v266_v52 = vmul.f32 %v264_v48, %v230_v17 }
  0xc3   : > { %v256_v53 = vsub.f32 1.5, %v255_v49 }
  0xc4   : > { %v277_v54 = vsel %vm276_vm3, %v264_v48, %v272_v51  ;;  %v268_v55 = vsub.f32 %v263_v50, %v266_v52 }
  0xc5   : > { %289 = vperm.xlu2 %480, %v277_v54   ;;  %v257_v56 = vmul.f32 %v486_v42, %v256_v53 }
  0xc6   : > { %v281_v57 = vrot.slane %v268_v55, 4 }
  0xc7   : > { %v261_v58 = vsel %vm260_vm6, %v486_v42, %v257_v56 }
  0xc8   : > { %v285_v59 = vsel %vm276_vm3, %v268_v55, %v281_v57  ;;  %v265_v60 = vmul.f32 %v262_v45, %v261_v58 }
  0xc9   : > { %303 = vperm.xlu0 %481, %v285_v59  }
  0xca   : > { %v273_v61 = vrot.slane %v265_v60, 4  ;;  %v267_v62 = vmul.f32 %v265_v60, %v231_v30 }
  0xcc   : > { %v278_v63 = vsel %vm276_vm3, %v265_v60, %v273_v61  ;;  %v269_v2 = vsub.f32 %v263_v50, %v267_v62 }
  0xcd   : > { %294 = vperm.xlu2 %480, %v278_v63  }
  0xce   : > { %v282_v3 = vrot.slane %v269_v2, 4 }
  0xd0   : > { %v286_v4 = vsel %vm276_vm3, %v269_v2, %v282_v3 }
  0xd1   : > { %308 = vperm.xlu1 %482, %v286_v4  }
 0x11f   : > { %v290_v7 = vpop.permute.xlu2 %289 }
 0x120   : > { %v297_v8 = vmul.f32 %v290_v7, %v705_v0  ;;  %v298_v9 = vmul.f32 %v290_v7, %v707_v1 }
 0x127   : > { %v295_v13 = vpop.permute.xlu2 %294 }
 0x128   : > { %v299_v0 = vmul.f32 %v295_v13, %v715_v5  ;;  %v300_v1 = vmul.f32 %v295_v13, %v717_v6 }
 0x13b   : > { %v304_v10 = vpop.permute.xlu0 %303 }
 0x13c   : > { %v311_v11 = vadd.f32 %v304_v10, %v297_v8  ;;  %v312_v12 = vadd.f32 %v304_v10, %v298_v9 }
 0x13e   : > { %315 = vst [vmem:[%s191_s10] sm:$0xff] %v311_v11 }
 0x13f   : > { %316 = vst [vmem:[%s191_s10 + $0x8] sm:$0xff] %v312_v12 }
 0x143   : > { %v309_v14 = vpop.permute.xlu1 %308 }
 0x144   : > { %v313_v15 = vadd.f32 %v309_v14, %v299_v0  ;;  %v314_v16 = vadd.f32 %v309_v14, %v300_v1 }
 0x146   : > { %317 = vst [vmem:[%s191_s10 + $0x10] sm:$0xff] %v313_v15 }
 0x147   : > { %318 = vst [vmem:[%s191_s10 + $0x18] sm:$0xff] %v314_v16 }
 0x148   : > { %544 = shalt.err (!%p541_p4)
}
 0x149   : > { %s588_s29 = smov 256   ;;  %s589_s5 = smov 16  }
 0x14a   : > { %431 = dma.vmem_to_hbm [thread:$0]  (%p659_p10), %s334_s20, 512, %s336_s22, %s320_s16, %s588_s29, %s588_s29, %s589_s5  }
 0x14b PF: > { %p442_p5 = scmp.ge.s32.totalorder %s583_s15, 2  ;;  %s350_s7 = sand.u32 1, %s571_s12  }
 0x14c   : > { %s351_s8 = scalar_lea.sflag [#allocation4], %s350_s7 }
 0x14d   : > { %p438_p7 = pnand %p442_p5, %p663_p11 }
 0x14f   : > { %p439_p8 = pneg %p438_p7 }
 0x151   : > { %566 = dma.done.wait (%p439_p8), %s351_s8, 512  }
 0x152   : > { %568 = vsyncadd (%p439_p8), %s351_s8, 4294966784  ;;  %p16_p9 = scmp.ge.s32.totalorder %s635_s18, 6   ;;  %s782_s12 = smov %s575_s13 }
 0x153   : > { %s783_s13 = smov %s579_s14  ;;  %s784_s14 = smov %s647_s21 }
 0x154   : > { %s785_s15 = smov %s635_s18  ;;  %18 = sbr.rel (!%p16_p9) target bundleno = 5 (0x5), region = 77 }
 0x159   :  { %357 = vsyncpa [#allocation3], 1 }
 0x15a   :  { %359 = vsyncpa [#allocation3 + $0x1], 1 }
 0x15b   :  { %360 = vsyncpa [#allocation4], 1 }
 0x15c   :  { %362 = vsyncpa [#allocation4 + $0x1], 1 }

</bundles_post_ra>
